<compile_context>
chip_gen: v7x
topology: tpu7x:2x2x1
jax: 0.10.0
libtpu: 0.0.40
codegen_flags: <defaults>
</compile_context>

<pallas_src>
import jax
import jax.numpy as jnp
from jax.experimental import pallas as pl
from jax.experimental.pallas import tpu as pltpu

LANES = 128            # lane width (last dim of every tile)
ACC_SUBLANES = 8       # vreg-shaped accumulator: (8, 128) f32
MAX_TILE_ROWS = 2048   # (2048,128) f32 tile = 1 MiB/buffer; 2 inputs x 2 bufs = 4 MiB VMEM
NUM_SHARDS = 2         # leading parallel axis (uses both TCs on v7x; serial elsewhere)


def _round_up(a, b):
    return (a + b - 1) // b * b


def _mse_partial_kernel(x_ref, t_ref, part_ref, acc_ref):
    """Per-shard sum of squared differences.

    Grid = (shards, steps_per_shard).  x_ref / t_ref are (groups, 8, 128) tiles;
    acc_ref is an (8, 128) f32 vreg-shaped accumulator kept resident across the
    inner ("arbitrary") reduction axis.
    """
    i = pl.program_id(1)

    @pl.when(i == 0)
    def _():
        acc_ref[...] = jnp.zeros_like(acc_ref)

    # Cast in-register (inputs arrive in native dtype, e.g. bf16 feature maps).
    d = x_ref[...].astype(jnp.float32) - t_ref[...].astype(jnp.float32)
    sq = d * d
    # Fold the (groups, 8, 128) tile onto the (8, 128) accumulator: pure VPU adds,
    # no per-step scalar/XLU reduction and no in-kernel reshape.
    acc_ref[...] = acc_ref[...] + sq.sum(axis=0)

    @pl.when(i == pl.num_programs(1) - 1)
    def _():
        # Emit the per-lane partial sums; the tiny cross-lane reduce + 1/N scale
        # happens once in the wrapper.
        part_ref[0] = acc_ref[...]


def custom_content_loss(x, target):
    """Returns (input_passthrough, mse_loss_scalar).

    Mirrors the nn.Module: the loss is what would be stashed on `self.loss`,
    and the input is returned unchanged.
    """
    assert x.shape == target.shape, "mse_loss requires matching shapes here"
    total_n = x.size

    # ---- choose tiling -------------------------------------------------------
    rows = _round_up(total_n, LANES) // LANES              # 128-lane rows
    tile_rows = min(MAX_TILE_ROWS, _round_up(rows, ACC_SUBLANES))
    shards = NUM_SHARDS if rows >= NUM_SHARDS * tile_rows else 1
    rows_padded = _round_up(rows, tile_rows * shards)
    steps = rows_padded // (tile_rows * shards)
    padded_len = rows_padded * LANES
    groups_per_tile = tile_rows // ACC_SUBLANES
    groups_total = rows_padded // ACC_SUBLANES

    # ---- lay out as a lane-dense (G, 8, 128) slab in NATIVE dtype -------------
    xf = x.reshape(-1)
    tf = target.reshape(-1)
    if padded_len != total_n:
        # Zero padding is exact for sum-of-squares (pads cancel in x - t).
        xf = jnp.pad(xf, (0, padded_len - total_n))
        tf = jnp.pad(tf, (0, padded_len - total_n))
    xf = xf.reshape(groups_total, ACC_SUBLANES, LANES)
    tf = tf.reshape(groups_total, ACC_SUBLANES, LANES)

    in_map = lambda s, i, _steps=steps: (s * _steps + i, 0, 0)

    partials = pl.pallas_call(
        _mse_partial_kernel,
        out_shape=jax.ShapeDtypeStruct((shards, ACC_SUBLANES, LANES), jnp.float32),
        grid_spec=pltpu.PrefetchScalarGridSpec(
            num_scalar_prefetch=0,
            grid=(shards, steps),
            in_specs=[
                pl.BlockSpec((groups_per_tile, ACC_SUBLANES, LANES), in_map),
                pl.BlockSpec((groups_per_tile, ACC_SUBLANES, LANES), in_map),
            ],
            out_specs=pl.BlockSpec((1, ACC_SUBLANES, LANES), lambda s, i: (s, 0, 0)),
            scratch_shapes=[pltpu.VMEM((ACC_SUBLANES, LANES), jnp.float32)],
        ),
        compiler_params=pltpu.CompilerParams(
            # shard axis independent -> "parallel" (megacore on v7x);
            # inner axis is the reduction with a resident accumulator -> "arbitrary".
            dimension_semantics=("parallel", "arbitrary"),
            # 2 inputs x 2 pipeline buffers x 1 MiB = 4 MiB; 32 MiB is safe headroom
            # on v5e (16 MiB default scoped) through v7x (64 MiB physical).
            vmem_limit_bytes=32 * 1024 * 1024,
        ),
    )(xf, tf)

    loss = jnp.sum(partials) / jnp.float32(total_n)
    # Identity passthrough of the input, as in the PyTorch forward.
    return x, loss


if __name__ == "__main__":
    key = jax.random.PRNGKey(0)
    k_in, k_tgt = jax.random.split(key)

    # Small shapes consistent with a content-loss feature map: N=2, C=4, H=W=16.
    x = jax.random.normal(k_in, (2, 4, 16, 16), dtype=jnp.float32)
    target = jax.random.normal(k_tgt, (2, 4, 16, 16), dtype=jnp.float32)  # "detached" target

    out, loss = custom_content_loss(x, target)
    out = jax.block_until_ready(out)
    loss = jax.block_until_ready(loss)

    # Correctness checks: identity passthrough + exact MSE semantics.
    ref_loss = jnp.mean((x - target) ** 2)
    assert out.shape == x.shape and out.dtype == x.dtype
    assert bool(jnp.all(out == x))
    assert jnp.allclose(loss, ref_loss, rtol=1e-6, atol=1e-6), (loss, ref_loss)

    print("KERNEL_OK")
</pallas_src>

<mosaic_0001>
module attributes {stable_mosaic.version = 11 : i64} {
  func.func @_mse_partial_kernel(%arg0: i32, %arg1: i32, %arg2: memref<2x8x128xf32, #tpu.memory_space<vmem>>, %arg3: memref<2x8x128xf32, #tpu.memory_space<vmem>>, %arg4: memref<1x8x128xf32, #tpu.memory_space<vmem>>, %arg5: memref<8x128xf32, #tpu.memory_space<vmem>>) attributes {dimension_semantics = [#tpu.dimension_semantics<parallel>, #tpu.dimension_semantics<arbitrary>], iteration_bounds = array<i64: 1, 1>, scalar_prefetch = 0 : i64, scratch_operands = 1 : i64, tpu.core_type = #tpu.core_type<tc>, window_params = [{transform_indices = @transform_0, window_bounds = array<i64: 2, 8, 128>}, {transform_indices = @transform_1, window_bounds = array<i64: 2, 8, 128>}, {transform_indices = @transform_2, window_bounds = array<i64: 1, 8, 128>}]} {
    %c0_i32 = arith.constant 0 : i32
    %0 = arith.cmpi eq, %arg1, %c0_i32 : i32
    %1 = arith.extui %0 : i1 to i32
    %c0_i32_0 = arith.constant 0 : i32
    %2 = arith.cmpi ne, %1, %c0_i32_0 : i32
    scf.if %2 {
      %cst_12 = arith.constant 0.000000e+00 : f32
      %14 = vector.broadcast %cst_12 : f32 to vector<8x128xf32>
      %c0_13 = arith.constant 0 : index
      %c0_14 = arith.constant 0 : index
      %15 = vector.load %arg5[%c0_13, %c0_14] : memref<8x128xf32, #tpu.memory_space<vmem>>, vector<8x128xf32>
      tpu.vector_store %arg5[%c0_13, %c0_14], %14 {strides = array<i32>} : memref<8x128xf32, #tpu.memory_space<vmem>>, vector<8x128xf32>,
    } else {
    }
    %c0 = arith.constant 0 : index
    %c0_1 = arith.constant 0 : index
    %c0_2 = arith.constant 0 : index
    %3 = vector.load %arg2[%c0, %c0_1, %c0_2] : memref<2x8x128xf32, #tpu.memory_space<vmem>>, vector<2x8x128xf32>
    %c0_3 = arith.constant 0 : index
    %c0_4 = arith.constant 0 : index
    %c0_5 = arith.constant 0 : index
    %4 = vector.load %arg3[%c0_3, %c0_4, %c0_5] : memref<2x8x128xf32, #tpu.memory_space<vmem>>, vector<2x8x128xf32>
    %5 = arith.subf %3, %4 : vector<2x8x128xf32>
    %6 = arith.mulf %5, %5 : vector<2x8x128xf32>
    %c0_6 = arith.constant 0 : index
    %c0_7 = arith.constant 0 : index
    %7 = vector.load %arg5[%c0_6, %c0_7] : memref<8x128xf32, #tpu.memory_space<vmem>>, vector<8x128xf32>
    %cst = arith.constant dense<0.000000e+00> : vector<8x128xf32>
    %8 = vector.multi_reduction <add>, %6, %cst [0] : vector<2x8x128xf32> to vector<8x128xf32>
    %9 = arith.addf %7, %8 : vector<8x128xf32>
    %c0_8 = arith.constant 0 : index
    %c0_9 = arith.constant 0 : index
    %10 = vector.load %arg5[%c0_8, %c0_9] : memref<8x128xf32, #tpu.memory_space<vmem>>, vector<8x128xf32>
    tpu.vector_store %arg5[%c0_8, %c0_9], %9 {strides = array<i32>} : memref<8x128xf32, #tpu.memory_space<vmem>>, vector<8x128xf32>,
    %c0_i32_10 = arith.constant 0 : i32
    %11 = arith.cmpi eq, %arg1, %c0_i32_10 : i32
    %12 = arith.extui %11 : i1 to i32
    %c0_i32_11 = arith.constant 0 : i32
    %13 = arith.cmpi ne, %12, %c0_i32_11 : i32
    scf.if %13 {
      %c0_12 = arith.constant 0 : index
      %c0_13 = arith.constant 0 : index
      %14 = vector.load %arg5[%c0_12, %c0_13] : memref<8x128xf32, #tpu.memory_space<vmem>>, vector<8x128xf32>
      %c0_14 = arith.constant 0 : index
      %c0_15 = arith.constant 0 : index
      %c0_16 = arith.constant 0 : index
      %15 = vector.load %arg4[%c0_14, %c0_15, %c0_16] : memref<1x8x128xf32, #tpu.memory_space<vmem>>, vector<1x8x128xf32>
      %16 = vector.shape_cast %15 : vector<1x8x128xf32> to vector<8x128xf32>
      %17 = vector.shape_cast %14 : vector<8x128xf32> to vector<1x8x128xf32>
      tpu.vector_store %arg4[%c0_14, %c0_15, %c0_16], %17 {strides = array<i32>} : memref<1x8x128xf32, #tpu.memory_space<vmem>>, vector<1x8x128xf32>,
    } else {
    }
    return
  }
  func.func @transform_0(%arg0: i32, %arg1: i32) -> (i32, i32, i32) {
    %c1_i32 = arith.constant 1 : i32
    %0 = arith.muli %arg0, %c1_i32 : i32
    %1 = arith.addi %0, %arg1 : i32
    %c0_i32 = arith.constant 0 : i32
    %c0_i32_0 = arith.constant 0 : i32
    %c0_i32_1 = arith.constant 0 : i32
    return %1, %c0_i32, %c0_i32_0 : i32, i32, i32
  }
  func.func @transform_1(%arg0: i32, %arg1: i32) -> (i32, i32, i32) {
    %c1_i32 = arith.constant 1 : i32
    %0 = arith.muli %arg0, %c1_i32 : i32
    %1 = arith.addi %0, %arg1 : i32
    %c0_i32 = arith.constant 0 : i32
    %c0_i32_0 = arith.constant 0 : i32
    %c0_i32_1 = arith.constant 0 : i32
    return %1, %c0_i32, %c0_i32_0 : i32, i32, i32
  }
  func.func @transform_2(%arg0: i32, %arg1: i32) -> (i32, i32, i32) {
    %c0_i32 = arith.constant 0 : i32
    %c0_i32_0 = arith.constant 0 : i32
    %c0_i32_1 = arith.constant 0 : i32
    return %arg0, %c0_i32, %c0_i32_0 : i32, i32, i32
  }
}

</mosaic_0001>

<bundles_post_ra>
// kernel: tpu_custom_call.1
= control target key start
LH: loop header
LB: loop body
LE: loop exit
PB: predicated region body
PF: predicated region fallthrough
CT: control target
= control target key end

     0   :  { %7 = vsyncpa [#allocation4], 0  ;;  %s223_s0 = inlined_call_operand.hbm [shape: f32[2,8,128], index: 0, kind: input, shape index: {}]   ;;  %s224_s1 = inlined_call_operand.hbm [shape: f32[2,8,128], index: 1, kind: input, shape index: {}]   ;;  %s225_s2 = inlined_call_operand.hbm [shape: f32[1,8,128], index: 2, kind: output, shape index: {}]  }
   0x1   :  { %8 = vsyncpa [#allocation7], 0 }
   0x2   :  { %9 = vsyncpa [#allocation5], 0  ;;  %s167_s9 = smov [#allocation3]   ;;  %s95_s13 = scalar_lea.hbm %s223_s0, 256 }
   0x3   :  { %s19_s10 = sshll.u32 %s167_s9, 4  ;;  %p96_p0 = scmp.ne.s32.totalorder %s223_s0, %s95_s13  ;;  %s20_s10 = int_to_ptr.vmem [resolvable:$true] %s19_s10 }
   0x4   :  { %p99_p1 = scmp.lt.u32.totalorder %s95_s13, %s223_s0 }
   0x6   :  { %p101_p2 = pnand %p99_p1, %p96_p0 }
   0x8   :  { %104 = shalt.err (!%p101_p2)
}
   0x9   :  { %s105_s18 = scalar_lea.vmem %s20_s10, 256  ;;  %p110_p4 = scmp.lt.s32.totalorder %s20_s10, %s20_s10 }
   0xa   :  { %p106_p3 = scmp.ne.s32.totalorder %s20_s10, %s105_s18  ;;  %p111_p5 = scmp.lt.s32.totalorder %s105_s18, %s105_s18 }
   0xc   :  { %p112_p6 = por %p111_p5, %p110_p4 }
   0xe   :  { %p113_p7 = pnand %p112_p6, %p106_p3 }
  0x10   :  { %116 = shalt.err (!%p113_p7)
}
  0x11   :  { %s168_s19 = smov 128   ;;  %s169_s20 = smov 8  }
  0x12   :  { %25 = dma.hbm_to_vmem [thread:$0]  %s223_s0, 256, %s20_s10, [#allocation4], %s168_s19, %s168_s19, %s169_s20  }
  0x13   :  { %s170_s23 = smov [#allocation6]   ;;  %s117_s27 = scalar_lea.hbm %s224_s1, 256 }
  0x14   :  { %s35_s24 = sshll.u32 %s170_s23, 4  ;;  %p118_p8 = scmp.ne.s32.totalorder %s224_s1, %s117_s27  ;;  %s36_s24 = int_to_ptr.vmem [resolvable:$true] %s35_s24 }
  0x15   :  { %p121_p9 = scmp.lt.u32.totalorder %s117_s27, %s224_s1 }
  0x17   :  { %p123_p10 = pnand %p121_p9, %p118_p8 }
  0x19   :  { %126 = shalt.err (!%p123_p10)
}
  0x1a   :  { %s127_s4 = scalar_lea.vmem %s36_s24, 256  ;;  %p132_p12 = scmp.lt.s32.totalorder %s36_s24, %s36_s24 }
  0x1b   :  { %p128_p11 = scmp.ne.s32.totalorder %s36_s24, %s127_s4  ;;  %p133_p13 = scmp.lt.s32.totalorder %s127_s4, %s127_s4 }
  0x1d   :  { %p134_p0 = por %p133_p13, %p132_p12 }
  0x1f   :  { %p135_p1 = pnand %p134_p0, %p128_p11 }
  0x21   :  { %138 = shalt.err (!%p135_p1)
}
  0x22   :  { %41 = dma.hbm_to_vmem [thread:$0]  %s224_s1, 256, %s36_s24, [#allocation7], %s168_s19, %s168_s19, %s169_s20  }
  0x23   :  { %161 = dma.done.wait [#allocation4], 256  }
  0x24   :  { %162 = vsyncadd [#allocation4], 4294967040 }
  0x25   :  { %163 = dma.done.wait [#allocation7], 256  }
  0x26   :  { %164 = vsyncadd [#allocation7], 4294967040  ;;  %v57_v0 = vld [vmem:[#allocation3] sm:$0xff]  ;;  %v58_v1 = vld [vmem:[#allocation3 + $0x8] sm:$0xff]  ;;  %s171_s6 = smov [#allocation8]  }
  0x27   :  { %v59_v2 = vld [vmem:[#allocation6] sm:$0xff]  ;;  %v60_v3 = vld [vmem:[#allocation6 + $0x8] sm:$0xff]  ;;  %s80_s7 = sshll.u32 %s171_s6, 4  ;;  %s81_s7 = int_to_ptr.vmem [resolvable:$true] %s80_s7 }
  0x28   :  { %v61_v4 = vsub.f32 %v57_v0, %v59_v2  ;;  %v62_v5 = vsub.f32 %v58_v1, %v60_v3  ;;  %s139_s8 = scalar_lea.vmem %s81_s7, 128  ;;  %p144_p3 = scmp.lt.s32.totalorder %s81_s7, %s81_s7 }
  0x29   :  { %p140_p2 = scmp.ne.s32.totalorder %s81_s7, %s139_s8  ;;  %p145_p4 = scmp.lt.s32.totalorder %s139_s8, %s139_s8 }
  0x2a   :  { %v63_v6 = vmul.f32 %v61_v4, %v61_v4  ;;  %v64_v7 = vmul.f32 %v62_v5, %v62_v5 }
  0x2b   :  { %p146_p5 = por %p145_p4, %p144_p3 }
  0x2c   :  { %v66_v8 = vadd.f32 %v64_v7, %v63_v6 }
  0x2d   :  { %p147_p6 = pnand %p146_p5, %p140_p2 }
  0x2e   :  { %73 = vst [vmem:[#allocation8] sm:$0xff] %v66_v8 }
  0x2f   :  { %150 = shalt.err (!%p147_p6)
}
  0x30   :  { %s151_s10 = scalar_lea.hbm %s225_s2, 128 }
  0x31   :  { %p152_p7 = scmp.ne.s32.totalorder %s225_s2, %s151_s10  ;;  %p155_p8 = scmp.lt.u32.totalorder %s151_s10, %s225_s2 }
  0x33   :  { %p157_p9 = pnand %p155_p8, %p152_p7 }
  0x35   :  { %160 = shalt.err (!%p157_p9)
}
  0x36   :  { %83 = dma.vmem_to_hbm [thread:$0]  %s81_s7, 128, %s225_s2, [#allocation5]  }
  0x37   :  { %165 = dma.done.wait [#allocation5], 128  }
  0x38   :  { %166 = vsyncadd [#allocation5], 4294967168 }
  0x39   :  { %87 = vsyncpa [#allocation4], 1 }
  0x3a   :  { %88 = vsyncpa [#allocation7], 1 }
  0x3b   :  { %89 = vsyncpa [#allocation5], 1 }

</bundles_post_ra>
